<compile_context>
chip_gen: v6e
topology: v6e:2x2x1
jax: 0.10.0
libtpu: 0.0.40
codegen_flags: <defaults>
</compile_context>

<pallas_src>
import math

import jax
import jax.numpy as jnp
from jax.experimental import pallas as pl
from jax.experimental.pallas import tpu as pltpu


def _round_up(x, m):
    return ((x + m - 1) // m) * m


def afm_kernel(ab_ref, qm_ref, u_ref, j_ref, o_ref):
    # ab_ref: (K_pad, NU)  VMEM-resident (alpha + beta).T, zero-padded
    # qm_ref: (K_pad, NQ)  VMEM-resident Q matrix,        zero-padded
    # u_ref : (1, TN) int32 user indices      (lane-dense sample stream)
    # j_ref : (1, TN) int32 question indices
    # o_ref : (1, TN) f32  sigmoid(logit)
    nu = ab_ref.shape[1]
    nq = qm_ref.shape[1]
    tn = u_ref.shape[1]

    u = u_ref[...]                                           # (1, TN)
    j = j_ref[...]                                           # (1, TN)

    # One-hot "gather" masks (exact: exactly one 1.0 per sample column).
    u_rows = jax.lax.broadcasted_iota(jnp.int32, (nu, tn), 0)
    j_rows = jax.lax.broadcasted_iota(jnp.int32, (nq, tn), 0)
    onehot_u = (u_rows == u).astype(jnp.float32)             # (NU, TN)
    onehot_j = (j_rows == j).astype(jnp.float32)             # (NQ, TN)

    # Gather-by-matmul on the MXU: select per-sample parameter columns.
    a_g = jnp.dot(ab_ref[...], onehot_u,
                  preferred_element_type=jnp.float32)        # (K_pad, TN)
    q_g = jnp.dot(qm_ref[...], onehot_j,
                  preferred_element_type=jnp.float32)        # (K_pad, TN)

    logit = jnp.sum(a_g * q_g, axis=0, keepdims=True)        # (1, TN)
    o_ref[...] = jax.nn.sigmoid(logit)


def afm_forward(alpha, beta, Q, users, questions, *, tile_n=None,
                vmem_budget=16 << 20):
    """alpha: (n_users, K) f32, beta: (K,) f32, Q: (K, n_questions) f32,
    users/questions: (N,) int32. Returns (N,) f32 probabilities."""
    N = users.shape[0]
    n_users, K = alpha.shape
    n_questions = Q.shape[1]

    # Sublane-aligned padded parameter shapes (zero padding is exact here).
    K_pad = _round_up(K, 8)
    nu_pad = _round_up(n_users, 8)
    nq_pad = _round_up(n_questions, 8)

    if tile_n is None:
        # Per-lane f32 words of VMEM per block (conservative):
        #   2 index streams x 2 pipeline buffers x 8 sublane pad
        # + output x 2 buffers x 8 sublane pad
        # + one-hot temporaries (nu_pad + nq_pad rows)
        # + gathered tiles / products / misc (~4 * K_pad rows)
        bytes_per_lane = 4 * (2 * 2 * 8 + 2 * 8 + (nu_pad + nq_pad) + 4 * K_pad)
        tile_n = (vmem_budget // bytes_per_lane) // 128 * 128
        tile_n = max(128, min(32768, tile_n))
    tile_n = max(128, _round_up(tile_n, 128))

    # Keep >= 2 grid steps when the problem allows it (v7x megacore sharding).
    n128 = _round_up(N, 128)
    if n128 >= 256:
        tile_n = min(tile_n, _round_up(n128 // 2, 128))
    tile_n = min(tile_n, n128)

    n_pad = _round_up(N, tile_n)
    pad = n_pad - N

    # --- XLA glue: only parameter prep + index padding (no per-sample math) --
    ab_t = (alpha.astype(jnp.float32)
            + beta.astype(jnp.float32)[None, :]).T                  # (K, n_users)
    ab_t_p = jnp.zeros((K_pad, nu_pad), jnp.float32).at[:K, :n_users].set(ab_t)
    q_p = jnp.zeros((K_pad, nq_pad), jnp.float32).at[:K, :n_questions].set(
        Q.astype(jnp.float32))

    # Padded tail samples reuse index 0 (valid) and are sliced off afterwards.
    users_p = jnp.pad(users.astype(jnp.int32), (0, pad)).reshape(1, n_pad)
    questions_p = jnp.pad(questions.astype(jnp.int32), (0, pad)).reshape(1, n_pad)

    out = pl.pallas_call(
        afm_kernel,
        out_shape=jax.ShapeDtypeStruct((1, n_pad), jnp.float32),
        grid_spec=pltpu.PrefetchScalarGridSpec(
            num_scalar_prefetch=0,
            grid=(n_pad // tile_n,),
            in_specs=[
                # Resident parameter tables (constant index_map -> fetched once).
                pl.BlockSpec((K_pad, nu_pad), lambda i: (0, 0)),
                pl.BlockSpec((K_pad, nq_pad), lambda i: (0, 0)),
                # Lane-dense per-sample index streams.
                pl.BlockSpec((1, tile_n), lambda i: (0, i)),
                pl.BlockSpec((1, tile_n), lambda i: (0, i)),
            ],
            out_specs=pl.BlockSpec((1, tile_n), lambda i: (0, i)),
        ),
        compiler_params=pltpu.CompilerParams(
            dimension_semantics=("parallel",),
            vmem_limit_bytes=48 << 20,
        ),
    )(ab_t_p, q_p, users_p, questions_p)

    return out[0, :N]


if __name__ == "__main__":
    # Small, deterministic problem consistent with the module's __init__.
    n_users, n_questions, n_KCs = 5, 6, 4
    N = 300  # enough samples to exercise padding and a multi-step grid

    key = jax.random.PRNGKey(0)
    k_alpha, k_beta, k_q, k_u, k_j = jax.random.split(key, 5)

    # alpha ~ xavier_uniform for a (n_users, n_KCs) matrix.
    bound = math.sqrt(6.0 / (n_users + n_KCs))
    alpha = jax.random.uniform(
        k_alpha, (n_users, n_KCs), jnp.float32, minval=-bound, maxval=bound)
    # beta = randn(n_KCs) / 2
    beta = jax.random.normal(k_beta, (n_KCs,), jnp.float32) / 2.0
    # Q matrix (binary KC-by-question), as in AFM.
    Q = (jax.random.uniform(k_q, (n_KCs, n_questions)) > 0.5).astype(jnp.float32)

    users = jax.random.randint(k_u, (N,), 0, n_users, dtype=jnp.int32)
    questions = jax.random.randint(k_j, (N,), 0, n_questions, dtype=jnp.int32)

    y = afm_forward(alpha, beta, Q, users, questions)
    y = jax.block_until_ready(y)

    # Pure-JAX reference for correctness (mirrors the PyTorch forward).
    sum1_ref = jnp.sum(alpha[users] * Q[:, questions].T, axis=1)
    sum2_ref = beta @ Q[:, questions]
    y_ref = jax.nn.sigmoid(sum1_ref + sum2_ref)

    assert y.shape == (N,)
    assert jnp.allclose(y, y_ref, atol=1e-6, rtol=1e-5)
    print("KERNEL_OK")
</pallas_src>

<mosaic_0001>
module attributes {stable_mosaic.version = 11 : i64} {
  func.func @afm_kernel(%arg0: i32, %arg1: memref<8x8xf32, #tpu.memory_space<vmem>>, %arg2: memref<8x8xf32, #tpu.memory_space<vmem>>, %arg3: memref<1x256xi32, #tpu.memory_space<vmem>>, %arg4: memref<1x256xi32, #tpu.memory_space<vmem>>, %arg5: memref<1x256xf32, #tpu.memory_space<vmem>>) attributes {dimension_semantics = [#tpu.dimension_semantics<parallel>], iteration_bounds = array<i64: 2>, scalar_prefetch = 0 : i64, scratch_operands = 0 : i64, tpu.core_type = #tpu.core_type<tc>, window_params = [{pipeline_mode = #tpu.pipeline_mode<synchronous>, transform_indices = @transform_0, window_bounds = array<i64: 8, 8>}, {pipeline_mode = #tpu.pipeline_mode<synchronous>, transform_indices = @transform_1, window_bounds = array<i64: 8, 8>}, {transform_indices = @transform_2, window_bounds = array<i64: 1, 256>}, {transform_indices = @transform_3, window_bounds = array<i64: 1, 256>}, {transform_indices = @transform_4, window_bounds = array<i64: 1, 256>}]} {
    %c0 = arith.constant 0 : index
    %c0_0 = arith.constant 0 : index
    %0 = vector.load %arg3[%c0, %c0_0] : memref<1x256xi32, #tpu.memory_space<vmem>>, vector<1x256xi32>
    %c0_1 = arith.constant 0 : index
    %c0_2 = arith.constant 0 : index
    %1 = vector.load %arg4[%c0_1, %c0_2] : memref<1x256xi32, #tpu.memory_space<vmem>>, vector<1x256xi32>
    %2 = tpu.iota {dimensions = array<i32: 0>} : vector<8x256xi32>
    %3 = tpu.iota {dimensions = array<i32: 0>} : vector<8x256xi32>
    %4 = vector.broadcast %0 : vector<1x256xi32> to vector<8x256xi32>
    %5 = arith.cmpi eq, %2, %4 : vector<8x256xi32>
    %6 = arith.extui %5 : vector<8x256xi1> to vector<8x256xi32>
    %7 = arith.sitofp %6 : vector<8x256xi32> to vector<8x256xf32>
    %8 = vector.broadcast %1 : vector<1x256xi32> to vector<8x256xi32>
    %9 = arith.cmpi eq, %3, %8 : vector<8x256xi32>
    %10 = arith.extui %9 : vector<8x256xi1> to vector<8x256xi32>
    %11 = arith.sitofp %10 : vector<8x256xi32> to vector<8x256xf32>
    %c0_3 = arith.constant 0 : index
    %c0_4 = arith.constant 0 : index
    %12 = vector.load %arg1[%c0_3, %c0_4] : memref<8x8xf32, #tpu.memory_space<vmem>>, vector<8x8xf32>
    %cst = arith.constant dense<0.000000e+00> : vector<8x256xf32>
    %13 = tpu.matmul %12, %7, %cst {dimension_numbers = #tpu.dot_dimension_numbers<[1], [0], [0], [1], [0, 0, 1, 1], [], []>} : vector<8x8xf32>, vector<8x256xf32>, vector<8x256xf32> -> vector<8x256xf32>
    %c0_5 = arith.constant 0 : index
    %c0_6 = arith.constant 0 : index
    %14 = vector.load %arg2[%c0_5, %c0_6] : memref<8x8xf32, #tpu.memory_space<vmem>>, vector<8x8xf32>
    %cst_7 = arith.constant dense<0.000000e+00> : vector<8x256xf32>
    %15 = tpu.matmul %14, %11, %cst_7 {dimension_numbers = #tpu.dot_dimension_numbers<[1], [0], [0], [1], [0, 0, 1, 1], [], []>} : vector<8x8xf32>, vector<8x256xf32>, vector<8x256xf32> -> vector<8x256xf32>
    %16 = arith.mulf %13, %15 : vector<8x256xf32>
    %cst_8 = arith.constant dense<0.000000e+00> : vector<256xf32>
    %17 = vector.multi_reduction <add>, %16, %cst_8 [0] : vector<8x256xf32> to vector<256xf32>
    %18 = vector.shape_cast %17 : vector<256xf32> to vector<1x256xf32>
    %19 = arith.negf %18 : vector<1x256xf32>
    %20 = math.exp %19 : vector<1x256xf32>
    %cst_9 = arith.constant 1.000000e+00 : f32
    %21 = vector.broadcast %cst_9 : f32 to vector<1x256xf32>
    %22 = arith.addf %21, %20 : vector<1x256xf32>
    %23 = arith.divf %21, %22 : vector<1x256xf32>
    %c0_10 = arith.constant 0 : index
    %c0_11 = arith.constant 0 : index
    %24 = vector.load %arg5[%c0_10, %c0_11] : memref<1x256xf32, #tpu.memory_space<vmem>>, vector<1x256xf32>
    tpu.vector_store %arg5[%c0_10, %c0_11], %23 {strides = array<i32>} : memref<1x256xf32, #tpu.memory_space<vmem>>, vector<1x256xf32>,
    return
  }
  func.func @transform_0(%arg0: i32) -> (i32, i32) {
    %c0_i32 = arith.constant 0 : i32
    %c0_i32_0 = arith.constant 0 : i32
    %c0_i32_1 = arith.constant 0 : i32
    return %c0_i32, %c0_i32_0 : i32, i32
  }
  func.func @transform_1(%arg0: i32) -> (i32, i32) {
    %c0_i32 = arith.constant 0 : i32
    %c0_i32_0 = arith.constant 0 : i32
    %c0_i32_1 = arith.constant 0 : i32
    return %c0_i32, %c0_i32_0 : i32, i32
  }
  func.func @transform_2(%arg0: i32) -> (i32, i32) {
    %c0_i32 = arith.constant 0 : i32
    %c0_i32_0 = arith.constant 0 : i32
    return %c0_i32, %arg0 : i32, i32
  }
  func.func @transform_3(%arg0: i32) -> (i32, i32) {
    %c0_i32 = arith.constant 0 : i32
    %c0_i32_0 = arith.constant 0 : i32
    return %c0_i32, %arg0 : i32, i32
  }
  func.func @transform_4(%arg0: i32) -> (i32, i32) {
    %c0_i32 = arith.constant 0 : i32
    %c0_i32_0 = arith.constant 0 : i32
    return %c0_i32, %arg0 : i32, i32
  }
}

</mosaic_0001>

<bundles_post_ra>
// kernel: tpu_custom_call.1
= control target key start
LH: loop header
LB: loop body
LE: loop exit
PB: predicated region body
PF: predicated region fallthrough
CT: control target
= control target key end

     0   :  { %9 = vsyncpa [#allocation3], 0  ;;  %s1080_s0 = inlined_call_operand.hbm [shape: f32[8,8], index: 0, kind: input, shape index: {}]   ;;  %s1081_s1 = inlined_call_operand.hbm [shape: f32[8,8], index: 1, kind: input, shape index: {}]   ;;  %s1082_s2 = inlined_call_operand.hbm [shape: s32[1,512], index: 2, kind: input, shape index: {}]   ;;  %s1083_s3 = inlined_call_operand.vmem [shape: s32[1,512], index: 3, kind: input, shape index: {}]   ;;  %s1084_s4 = inlined_call_operand.hbm [shape: f32[1,512], index: 4, kind: output, shape index: {}]  }
   0x1   :  { %10 = vsyncpa [#allocation6], 0 }
   0x2   :  { %11 = vsyncpa [#allocation4], 0 }
   0x3   :  { %13 = vsyncpa [#allocation4 + $0x1], 0  ;;  %s900_s15 = smov 0   ;;  %s902_s16 = smov 0  }
   0x4   :  { %s904_s17 = smov 0   ;;  %s906_s18 = smov 0  }
   0x5 LB: > { %s921_s19 = sadd.s32 4294967295, %s866_s18   ;;  %s603_s20 = sadd.s32 4294967294, %s866_s18   ;;  %s866_s18 = sphi %s906_s18, %s1108_s18   ;;  %s862_s17 = sphi %s904_s17, %s1107_s17   ;;  %s858_s16 = sphi %s902_s16, %s1106_s16   ;;  %s854_s15 = sphi %s900_s15, %s1105_s15  }
   0x6   : > { %p81_p0 = scmp.ne.s32.totalorder %s858_s16, %s854_s15  ;;  %p1085_p1 = scmp.eq.s32.totalorder %s921_s19, 0 }
   0x7   : > { %p137_p3 = scmp.eq.s32.totalorder %s603_s20, 1  ;;  %p604_p5 = scmp.ge.s32.totalorder %s866_s18, 1 }
   0x8   : > { %p930_p4 = por %p1085_p1, %p81_p0  ;;  %p144_p7 = scmp.lt.s32.totalorder %s866_s18, 3 }
   0x9   : > { %p935_p6 = por %p137_p3, %p81_p0  ;;  %s868_s24 = smov [#allocation2]  }
   0xa   : > { %s1089_s21 = scalar_select %p930_p4, 1, 0 }
   0xb   : > { %s1090_s22 = scalar_select %p935_p6, 1, 0 }
   0xc   : > { %p940_p8 = pnand %p604_p5, %p144_p7  ;;  %s157_s25 = sshll.u32 %s868_s24, 4  ;;  %s158_s25 = int_to_ptr.vmem [resolvable:$true] %s157_s25 }
   0xd   : > { %s869_s26 = smov [#allocation5]   ;;  %s954_s29 = sadd.s32 1, %s866_s18  }
   0xe   : > { %s1091_s23 = scalar_select %p940_p8, 1, 0 }
   0xf   : > { %p648_p10 = pneg %p940_p8  ;;  %s168_s27 = sshll.u32 %s869_s26, 4  ;;  %s169_s27 = int_to_ptr.vmem [resolvable:$true] %s168_s27 }
  0x10   : > { %s65_s30 = ssub.s32 %s866_s18, %s954_s29  ;;  %s725_s5 = scalar_lea.vmem %s158_s25, 128 }
  0x11   : > { %p949_p11 = pnand %p648_p10, %p1085_p1  ;;  %p726_p13 = scmp.ne.s32.totalorder %s158_s25, %s725_s5 }
  0x12   : > { %p733_p5 = scmp.lt.s32.totalorder %s158_s25, %s158_s25  ;;  %p734_p7 = scmp.lt.s32.totalorder %s725_s5, %s725_s5 }
  0x13   : > { %p716_p12 = pneg %p949_p11 }
  0x14   : > { %p735_p10 = por %p734_p7, %p733_p5 }
  0x15   : > { %p728_p0 = pnand %p726_p13, %p716_p12 }
  0x17   : > { %p729_p3 = pneg %p728_p0 }
  0x19   : > { %p736_p9 = pnand %p735_p10, %p729_p3 }
  0x1b   : > { %739 = shalt.err (!%p736_p9)
}
  0x1c   : > { %651 = dma.hbm_to_vmem [thread:$0]  (!%p949_p11), %s1080_s0, 128, %s158_s25, [#allocation3]  }
  0x1d   : > { %s751_s8 = scalar_lea.vmem %s169_s27, 128  ;;  %p759_p13 = scmp.lt.s32.totalorder %s169_s27, %s169_s27 }
  0x1e   : > { %p752_p1 = scmp.ne.s32.totalorder %s169_s27, %s751_s8  ;;  %p760_p0 = scmp.lt.s32.totalorder %s751_s8, %s751_s8 }
  0x20   : > { %p754_p2 = pnand %p752_p1, %p716_p12  ;;  %p761_p4 = por %p760_p0, %p759_p13 }
  0x22   : > { %p755_p6 = pneg %p754_p2 }
  0x24   : > { %p762_p8 = pnand %p761_p4, %p755_p6 }
  0x26   : > { %765 = shalt.err (!%p762_p8)
}
  0x27   : > { %654 = dma.hbm_to_vmem [thread:$0]  (!%p949_p11), %s1081_s1, 128, %s169_s27, [#allocation6]  }
  0x28   : > { %p66_p1 = scmp.eq.s32.totalorder %s65_s30, 0  ;;  %s68_s11 = sadd.s32 1, %s862_s17 }
  0x29   : > { %p75_p2 = scmp.ne.s32.totalorder %s862_s17, %s858_s16  ;;  %p76_p4 = scmp.eq.s32.totalorder %s866_s18, 0 }
  0x2a   : > { %s981_s12 = scalar_select %p66_p1, %s862_s17, %s68_s11  }
  0x2b   : > { %p77_p6 = por %p76_p4, %p75_p2  ;;  %p1093_p8 = scmp.eq.s32.totalorder %s921_s19, 1 }
  0x2c   : > { %p665_p12 = scmp.lt.s32.totalorder %s866_s18, 2  ;;  %s179_s14 = sand.u32 1, %s866_s18  }
  0x2d   : > { %p985_p9 = por %p1093_p8, %p75_p2  ;;  %s181_s20 = sand.u32 1, %s862_s17  }
  0x2e   : > { %s608_s24 = sshll.u32 %s181_s20, 1  ;;  %s634_s25 = sshll.u32 %s866_s18, 5 }
  0x2f   : > { %s1094_s13 = scalar_select %p985_p9, 1, 0 }
  0x30   : > { %s996_s27 = scalar_lea.hbm %s1082_s2, %s634_s25  ;;  %s183_s30 = scalar_lea.vmem [#allocation7], %s608_s24 }
  0x31   : > { %s191_s5 = sshll.u32 %s183_s30, 4  ;;  %p998_p11 = pnand %p665_p12, %p77_p6  ;;  %s192_s5 = int_to_ptr.vmem [resolvable:$true] %s191_s5 }
  0x32   : > { %s180_s7 = scalar_lea.sflag [#allocation3], %s179_s14  ;;  %s766_s8 = scalar_lea.hbm %s996_s27, 32 }
  0x33   : > { %p767_p3 = scmp.ne.s32.totalorder %s996_s27, %s766_s8  ;;  %p768_p5 = pneg %p998_p11 }
  0x34   : > { %s771_s11 = scalar_lea.hbm %s1082_s2, 64  ;;  %p772_p13 = scmp.lt.s32.totalorder %s996_s27, %s1082_s2 }
  0x35   : > { %p769_p7 = pnand %p768_p5, %p767_p3  ;;  %p773_p0 = scmp.lt.s32.totalorder %s771_s11, %s766_s8 }
  0x37   : > { %p770_p10 = pneg %p769_p7  ;;  %p774_p1 = por %p773_p0, %p772_p13 }
  0x39   : > { %p775_p2 = pnand %p774_p1, %p770_p10 }
  0x3b   : > { %778 = shalt.err (!%p775_p2)
}
  0x3c   : > { %s779_s25 = scalar_lea.vmem %s192_s5, 32  ;;  %s870_s14 = smov [#allocation7]  }
  0x3d   : > { %p780_p4 = scmp.ne.s32.totalorder %s192_s5, %s779_s25  ;;  %s784_s26 = sshll.u32 %s870_s14, 4  ;;  %s785_s26 = int_to_ptr.vmem [resolvable:$false] %s784_s26 }
  0x3e   : > { %s786_s28 = scalar_lea.vmem %s785_s26, 64  ;;  %p787_p12 = scmp.lt.s32.totalorder %s192_s5, %s785_s26 }
  0x3f   : > { %p782_p6 = pnand %p780_p4, %p768_p5  ;;  %p788_p3 = scmp.lt.s32.totalorder %s786_s28, %s779_s25 }
  0x41   : > { %p783_p8 = pneg %p782_p6  ;;  %p789_p7 = por %p788_p3, %p787_p12 }
  0x43   : > { %p790_p9 = pnand %p789_p7, %p783_p8 }
  0x45   : > { %793 = shalt.err (!%p790_p9)
}
  0x46   : > { %658 = dma.hbm_to_vmem [thread:$0]  (!%p998_p11), %s996_s27, 32, %s192_s5, %s180_s7  }
  0x47   : > { %p1096_p10 = scmp.ne.s32.totalorder %s1091_s23, 0 }
  0x48   : > { %p1097_p13 = scmp.eq.s32.totalorder (!%p1096_p10), %s921_s19, 0 }
  0x49   : > { %208 = sbr.rel (%p1096_p10) target bundleno = 359 (0x167), region = 36 }
  0x4e   : > { %837 = dma.done.wait (%p1097_p13), [#allocation3], 128   ;;  %p1098_p5 = pmov %p1097_p13 }
  0x50   : > { %839 = vsyncadd (%p1098_p5), [#allocation3], 4294967168  ;;  %p1099_p0 = pmov %p1098_p5 }
  0x52   : > { %841 = dma.done.wait (%p1099_p0), [#allocation6], 128   ;;  %p1100_p1 = pmov %p1099_p0 }
  0x53   : > { %s218_s27 = sand.u32 1, %s921_s19   ;;  %s220_s30 = sand.u32 1, %s858_s16  }
  0x54   : > { %843 = vsyncadd (%p1100_p1), [#allocation6], 4294967168  ;;  %s1030_s23 = sshll.u32 %s220_s30, 1  ;;  %s219_s5 = scalar_lea.sflag [#allocation3], %s218_s27 }
  0x55   : > { %s222_s6 = scalar_lea.vmem [#allocation7], %s1030_s23  ;;  %p1101_p9 = scmp.ne.s32.totalorder %s1089_s21, 0 }
  0x57   : > { %845 = dma.done.wait (%p1101_p9), %s219_s5, 32  }
  0x58   : > { %847 = vsyncadd (%p1101_p9), %s219_s5, 4294967264  ;;  %v260_v0 = vlaneseq  ;;  %s616_s7 = sshll.u32 %s921_s19, 1  ;;  %v871_v1 = vmov 0.0   ;;  %v258_v5 = vld [vmem:[%s222_s6] sm:$0x3]  ;;  %vm291_vm0 = vcmask 64512  }
  0x59   : > { %p253_p11 = scmp.lt.s32.totalorder %s616_s7, 3  ;;  %359 = vmatprep.mubr.f32.mxu0 %v871_v1  ;;  %434 = vmatprep.mubr.f32.mxu1 %v871_v1  ;;  %v290_v11 = vld [vmem:[#allocation2] sm:$0xff]  ;;  %v366_v12 = vld [vmem:[#allocation5] sm:$0xff]  ;;  %v872_v13 = vmov 1.0   ;;  %v873_v38 = vmov 1966171168  }
  0x5a   : > { %v261_v2 = vshrl.u32 %v260_v0, 7  ;;  %v471_v39 = vunpack.c.l.s4 %v873_v38  ;;  %s635_s21 = sshll.u32 %s921_s19, 5  ;;  %s250_s11 = scalar_lea.vmem [#allocation8], %s1030_s23  ;;  %vm487_vm5 = vcmp.lt.s32.totalorder %v260_v0, 256 }
  0x5b   : > { %s1110_s7 = smov (!%p253_p11, %s616_s7), 3  ;;  %s505_s20 = sshll.u32 %s250_s11, 4  ;;  %s506_s20 = int_to_ptr.vmem [resolvable:$true] %s505_s20 }
  0x5c   : > { %v268_v3 = vsub.s32 1, %v261_v2  ;;  %v264_v4 = vsub.s32 0, %v261_v2  ;;  %s255_s10 = scalar_lea.vmem %s1083_s3, %s1110_s7  ;;  %v472_v40 = vunpack.c.0.s8 %v471_v39  ;;  %s503_s14 = scalar_lea.hbm %s1084_s4, %s635_s21 }
  0x5d   : > { %v259_v6 = vld [vmem:[%s255_s10] sm:$0x3]  ;;  %s491_s26 = scalar_lea.sflag [#allocation4], %s220_s30  ;;  %s794_s28 = scalar_lea.vmem %s506_s20, 32 }
  0x5e   : > { %v269_v7 = vrot.slane %v258_v5, %v268_v3  ;;  %v283_v8 = vrot.slane %v259_v6, %v268_v3  ;;  %v265_v9 = vrot.slane %v258_v5, %v264_v4  ;;  %v279_v10 = vrot.slane %v259_v6, %v264_v4  ;;  %p795_p2 = scmp.ne.s32.totalorder %s506_s20, %s794_s28  ;;  %p1102_p4 = scmp.ne.s32.totalorder %s1094_s13, 0 }
  0x5f   : > { %v475_v42 = vsub.s32 %v472_v40, %v261_v2  ;;  %s874_s19 = smov [#allocation8]  }
  0x60   : > { %vm271_vm1 = vcmp.eq.s32.totalorder %v261_v2, %v269_v7  ;;  %vm285_vm2 = vcmp.eq.s32.totalorder %v261_v2, %v283_v8  ;;  %vm270_vm3 = vcmp.eq.s32.totalorder %v261_v2, %v265_v9  ;;  %vm284_vm4 = vcmp.eq.s32.totalorder %v261_v2, %v279_v10  ;;  %p796_p6 = pnand %p795_p2, %p1102_p4  ;;  %s798_s27 = sshll.u32 %s874_s19, 4  ;;  %s799_s27 = int_to_ptr.vmem [resolvable:$false] %s798_s27 }
  0x61   : > { %621 = vmatprep.subr.msk.mxu0 %vm271_vm1, %v872_v13  ;;  %624 = vmatprep.subr.msk.mxu1 %vm285_vm2, %v872_v13  ;;  %s800_s23 = scalar_lea.vmem %s799_s27, 64  ;;  %p801_p12 = scmp.lt.s32.totalorder %s506_s20, %s799_s27 }
  0x62   : > { %622 = vmatpush1.msk.msra.mxu0 %vm270_vm3, %v872_v13  ;;  %625 = vmatpush1.msk.msra.mxu1 %vm284_vm4, %v872_v13  ;;  %p797_p8 = pneg %p796_p6  ;;  %p802_p3 = scmp.lt.s32.totalorder %s800_s23, %s794_s28 }
  0x63   : > { %623 = vmatmul.mubr.msk.f32.vlgmr.msra.gmra.mxu0 %vm291_vm0, %v290_v11  ;;  %626 = vmatmul.mubr.msk.f32.vlgmr.msra.gmra.mxu1 %vm291_vm0, %v366_v12 }
  0x64   : > { %p803_p7 = por %p802_p3, %p801_p12 }
  0x66   : > { %p804_p10 = pnand %p803_p7, %p797_p8 }
 0x123   : > { %v361_v14 = vpop.f32.mrf.mxu0  ;;  %v436_v15 = vpop.f32.mrf.mxu1 }
 0x124   : > { %v441_v16 = vmul.f32 %v436_v15, %v361_v14 }
 0x125   : > { %v363_v17 = vpop.f32.mrf.mxu0  ;;  %v438_v18 = vpop.f32.mrf.mxu1 }
 0x126   : > { %v443_v19 = vrot.slane %v441_v16, 4  ;;  %v442_v20 = vmul.f32 %v438_v18, %v363_v17 }
 0x128   : > { %v444_v21 = vadd.f32 %v443_v19, %v441_v16  ;;  %v449_v22 = vrot.slane %v442_v20, 4 }
 0x12a   : > { %v445_v23 = vrot.slane %v444_v21, 2  ;;  %v450_v24 = vadd.f32 %v449_v22, %v442_v20 }
 0x12c   : > { %v446_v25 = vadd.f32 %v445_v23, %v444_v21  ;;  %v451_v26 = vrot.slane %v450_v24, 2 }
 0x12e   : > { %v447_v27 = vrot.slane %v446_v25, 1  ;;  %v452_v28 = vadd.f32 %v451_v26, %v450_v24 }
 0x130   : > { %v448_v29 = vadd.f32 %v447_v27, %v446_v25  ;;  %v453_v30 = vrot.slane %v452_v28, 1 }
 0x132   : > { %v627_v31 = vmul.f32 -1.442695, %v448_v29  ;;  %v454_v32 = vadd.f32 %v453_v30, %v452_v28 }
 0x134   : > { %706 = vpow2.f32 %v627_v31  ;;  %v628_v33 = vmul.f32 -1.442695, %v454_v32 }
 0x136   : > { %708 = vpow2.f32 %v628_v33 }
 0x141   : > { %v707_v34 = vpop.eup %706 }
 0x142   : > { %v461_v35 = vadd.f32 1.0, %v707_v34 }
 0x143   : > { %v709_v36 = vpop.eup %708 }
 0x144   : > { %v462_v37 = vadd.f32 1.0, %v709_v36  ;;  %710 = vrcp.f32 %v461_v35 }
 0x146   : > { %712 = vrcp.f32 %v462_v37 }
 0x151   : > { %v711_v41 = vpop.eup %710 }
 0x153   : > { %v713_v43 = vpop.eup %712 }
 0x154   : > { %v469_v44 = vcombine.low %v711_v41, %v713_v43 }
 0x156   : > { %v476_v45 = vrot.slane %v469_v44, %v475_v42 }
 0x158   : > { %v483_v46 = vrot.slane %v476_v45, %v475_v42 }
 0x15a   : > { %489 = vst.msk [vmem:[%s250_s11] sm:$0x3] %vm487_vm5, %v483_v46 }
 0x15b   : > { %807 = shalt.err (!%p804_p10)
}
 0x15c   : > { %s808_s5 = scalar_lea.hbm %s503_s14, 32  ;;  %s812_s7 = scalar_lea.hbm %s1084_s4, 64 }
 0x15d   : > { %p809_p13 = scmp.ne.s32.totalorder %s503_s14, %s808_s5  ;;  %p813_p1 = scmp.lt.s32.totalorder %s503_s14, %s1084_s4 }
 0x15e   : > { %p814_p9 = scmp.lt.s32.totalorder %s812_s7, %s808_s5 }
 0x15f   : > { %p810_p5 = pnand %p809_p13, %p1102_p4 }
 0x160   : > { %p815_p11 = por %p814_p9, %p813_p1 }
 0x161   : > { %p811_p0 = pneg %p810_p5 }
 0x163   : > { %p816_p2 = pnand %p815_p11, %p811_p0 }
 0x165   : > { %819 = shalt.err (!%p816_p2)
}
 0x166   : > { %646 = dma.vmem_to_hbm [thread:$0]  (%p1102_p4), %s506_s20, 32, %s503_s14, %s491_s26  }
 0x167 PF: > { %s517_s10 = sand.u32 1, %s854_s15   ;;  %p1103_p6 = scmp.ne.s32.totalorder %s1090_s22, 0 }
 0x168   : > { %p1104_p8 = scmp.ge.s32.totalorder %s866_s18, 2  ;;  %s518_s21 = scalar_lea.sflag [#allocation4], %s517_s10 }
 0x16a   : > { %p660_p12 = pnand %p1104_p8, %p1103_p6 }
 0x16c   : > { %p661_p3 = pneg %p660_p12 }
 0x16e   : > { %849 = dma.done.wait (%p661_p3), %s518_s21, 32  }
 0x16f   : > { %851 = vsyncadd (%p661_p3), %s518_s21, 4294967264  ;;  %p16_p7 = scmp.ge.s32.totalorder %s954_s29, 4   ;;  %s1105_s15 = smov %s858_s16 }
 0x170   : > { %s1106_s16 = smov %s862_s17  ;;  %s1107_s17 = smov %s981_s12 }
 0x171   : > { %s1108_s18 = smov %s954_s29  ;;  %18 = sbr.rel (!%p16_p7) target bundleno = 5 (0x5), region = 91 }
 0x176   :  { %523 = vsyncpa [#allocation3], 1 }
 0x177   :  { %525 = vsyncpa [#allocation3 + $0x1], 1 }
 0x178   :  { %526 = vsyncpa [#allocation6], 1 }
 0x179   :  { %527 = vsyncpa [#allocation4], 1 }
 0x17a   :  { %529 = vsyncpa [#allocation4 + $0x1], 1 }

</bundles_post_ra>
